<compile_context>
chip_gen: v6e
topology: v6e:2x2x1
jax: 0.10.0
libtpu: 0.0.40
codegen_flags: <defaults>
</compile_context>

<pallas_src>
import jax
import jax.numpy as jnp
from jax.experimental import pallas as pl
from jax.experimental.pallas import tpu as pltpu


def _focus_conv_kernel(x_ref, w_ref, shift_ref, o_ref):
    # x_ref: (tm, K) bf16; w_ref: (K, C2) bf16 (BN scale folded in); shift_ref: (1, C2) f32
    acc = jnp.dot(x_ref[...], w_ref[...], preferred_element_type=jnp.float32)   # (tm, C2) f32
    y = acc + shift_ref[...]                                # BatchNorm shift
    y = y * jnp.clip(y + 3.0, 0.0, 6.0) * (1.0 / 6.0)       # Hardswish: x*relu6(x+3)/6
    # In-kernel transpose (XLU) -> lane-dense (C2, tm) store, already NCHW-ordered.
    o_ref[...] = jnp.transpose(y).astype(o_ref.dtype)


def _pick_tm(m_img, cap=4096):
    # Full-extent block is always layout-legal; otherwise use a multiple of 128.
    if m_img <= cap:
        return m_img
    return cap


def focus_forward(x, conv_weight, bn_gamma, bn_beta, bn_mean, bn_var, eps=1e-5):
    """x: (B, C1, H, W) NCHW.  conv_weight: (C2, 4*C1, 1, 1).  Returns (B, C2, H/2, W/2)."""
    B, C1, H, W = x.shape
    C2 = conv_weight.shape[0]
    H2, W2 = H // 2, W // 2
    K = 4 * C1
    M_img = H2 * W2

    # --- space-to-depth + channels-last in ONE pass ---
    # (B,C1,H2,r,W2,w) -> (B,H2,W2,w,r,C1); K index = (2*col_off + row_off)*C1 + c,
    # matching torch.cat([x[...,::2,::2], x[...,1::2,::2], x[...,::2,1::2], x[...,1::2,1::2]], 1)
    xr = x.reshape(B, C1, H2, 2, W2, 2)
    x_flat = jnp.transpose(xr, (0, 2, 4, 5, 3, 1)).reshape(B, M_img, K)
    x_flat = x_flat.astype(jnp.bfloat16)

    # --- fold eval-mode BatchNorm into the weight (scale) and a bias (shift) ---
    inv_std = 1.0 / jnp.sqrt(bn_var.astype(jnp.float32) + eps)
    scale = bn_gamma.astype(jnp.float32) * inv_std                         # (C2,)
    shift = (bn_beta.astype(jnp.float32)
             - bn_mean.astype(jnp.float32) * scale).reshape(1, C2)         # (1, C2)

    w_mat = conv_weight.reshape(C2, K).T.astype(jnp.float32)               # (K, C2)
    w_scaled = (w_mat * scale[None, :]).astype(jnp.bfloat16)               # (K, C2) bf16

    tm = _pick_tm(M_img)
    n_tiles = pl.cdiv(M_img, tm)

    cost = pl.CostEstimate(
        flops=int(2 * B * M_img * K * C2 + 5 * B * M_img * C2),
        transcendentals=0,
        bytes_accessed=int(B * M_img * K * 2 + B * M_img * C2 * 4 + K * C2 * 2 + C2 * 4),
    )

    out = pl.pallas_call(
        _focus_conv_kernel,
        out_shape=jax.ShapeDtypeStruct((B, C2, M_img), jnp.float32),
        grid_spec=pltpu.PrefetchScalarGridSpec(
            num_scalar_prefetch=0,
            grid=(B, n_tiles),
            in_specs=[
                pl.BlockSpec((None, tm, K), lambda b, i: (b, i, 0)),   # x rows (bf16)
                pl.BlockSpec((K, C2), lambda b, i: (0, 0)),            # weight, resident
                pl.BlockSpec((1, C2), lambda b, i: (0, 0)),            # BN shift, resident
            ],
            out_specs=pl.BlockSpec((None, C2, tm), lambda b, i: (b, 0, i)),
        ),
        compiler_params=pltpu.CompilerParams(
            dimension_semantics=("parallel", "parallel"),
            vmem_limit_bytes=32 * 1024 * 1024,
        ),
        cost_estimate=cost,
    )(x_flat, w_scaled, shift)

    # (B, C2, M_img) -> (B, C2, H2, W2): trailing-dims reshape only, no transpose.
    return out.reshape(B, C2, H2, W2)


def _reference(x, conv_weight, bn_gamma, bn_beta, bn_mean, bn_var, eps=1e-5):
    """Pure-JAX f32 reference of Focus.forward (eval-mode BN)."""
    p00 = x[:, :, 0::2, 0::2]
    p10 = x[:, :, 1::2, 0::2]
    p01 = x[:, :, 0::2, 1::2]
    p11 = x[:, :, 1::2, 1::2]
    cat = jnp.concatenate([p00, p10, p01, p11], axis=1)          # (B, 4C1, H2, W2)
    w = conv_weight[:, :, 0, 0]                                  # (C2, 4C1)
    y = jnp.einsum("bkhw,nk->bnhw", cat, w)
    sc = (bn_gamma / jnp.sqrt(bn_var + eps))[None, :, None, None]
    sh = (bn_beta - bn_mean * bn_gamma / jnp.sqrt(bn_var + eps))[None, :, None, None]
    y = y * sc + sh
    return y * jnp.clip(y + 3.0, 0.0, 6.0) / 6.0


if __name__ == "__main__":
    key = jax.random.PRNGKey(0)
    k_x, k_w, k_g, k_b, k_m, k_v = jax.random.split(key, 6)

    B, C1, H, W = 2, 4, 16, 16
    C2 = 32
    K = 4 * C1

    x = jax.random.normal(k_x, (B, C1, H, W), dtype=jnp.float32)
    conv_weight = jax.random.normal(k_w, (C2, K, 1, 1), dtype=jnp.float32) * 0.1
    bn_gamma = 1.0 + 0.1 * jax.random.normal(k_g, (C2,), dtype=jnp.float32)
    bn_beta = 0.1 * jax.random.normal(k_b, (C2,), dtype=jnp.float32)
    bn_mean = 0.1 * jax.random.normal(k_m, (C2,), dtype=jnp.float32)
    bn_var = jnp.abs(jax.random.normal(k_v, (C2,), dtype=jnp.float32)) + 0.5

    out = focus_forward(x, conv_weight, bn_gamma, bn_beta, bn_mean, bn_var)
    out = jax.block_until_ready(out)

    ref = _reference(x, conv_weight, bn_gamma, bn_beta, bn_mean, bn_var)
    assert out.shape == (B, C2, H // 2, W // 2)
    # bf16 matmul inputs (f32 accumulation) -> relaxed tolerance vs the f32 reference.
    assert jnp.allclose(out, ref, atol=2e-2, rtol=2e-2), (
        float(jnp.max(jnp.abs(out - ref))))

    print("KERNEL_OK")
</pallas_src>

<mosaic_0001>
module attributes {stable_mosaic.version = 11 : i64} {
  func.func @_focus_conv_kernel(%arg0: i32, %arg1: i32, %arg2: memref<1x64x16xbf16, #tpu.memory_space<vmem>>, %arg3: memref<16x32xbf16, #tpu.memory_space<vmem>>, %arg4: memref<1x32xf32, #tpu.memory_space<vmem>>, %arg5: memref<1x32x64xf32, #tpu.memory_space<vmem>>) attributes {dimension_semantics = [#tpu.dimension_semantics<parallel>, #tpu.dimension_semantics<parallel>], iteration_bounds = array<i64: 2, 1>, scalar_prefetch = 0 : i64, scratch_operands = 0 : i64, tpu.core_type = #tpu.core_type<tc>, window_params = [{transform_indices = @transform_0, window_bounds = array<i64: 1, 64, 16>}, {pipeline_mode = #tpu.pipeline_mode<synchronous>, transform_indices = @transform_1, window_bounds = array<i64: 16, 32>}, {pipeline_mode = #tpu.pipeline_mode<synchronous>, transform_indices = @transform_2, window_bounds = array<i64: 1, 32>}, {transform_indices = @transform_3, window_bounds = array<i64: 1, 32, 64>}]} {
    %c0 = arith.constant 0 : index
    %c0_0 = arith.constant 0 : index
    %c0_1 = arith.constant 0 : index
    %0 = vector.load %arg2[%c0, %c0_0, %c0_1] : memref<1x64x16xbf16, #tpu.memory_space<vmem>>, vector<1x64x16xbf16>
    %1 = vector.shape_cast %0 : vector<1x64x16xbf16> to vector<64x16xbf16>
    %c0_2 = arith.constant 0 : index
    %c0_3 = arith.constant 0 : index
    %2 = vector.load %arg3[%c0_2, %c0_3] : memref<16x32xbf16, #tpu.memory_space<vmem>>, vector<16x32xbf16>
    %cst = arith.constant dense<0.000000e+00> : vector<64x32xf32>
    %3 = tpu.matmul %1, %2, %cst {dimension_numbers = #tpu.dot_dimension_numbers<[1], [0], [0], [1], [0, 0, 1, 1], [], []>} : vector<64x16xbf16>, vector<16x32xbf16>, vector<64x32xf32> -> vector<64x32xf32>
    %c0_4 = arith.constant 0 : index
    %c0_5 = arith.constant 0 : index
    %4 = vector.load %arg4[%c0_4, %c0_5] : memref<1x32xf32, #tpu.memory_space<vmem>>, vector<1x32xf32>
    %5 = vector.broadcast %4 : vector<1x32xf32> to vector<64x32xf32>
    %6 = arith.addf %3, %5 : vector<64x32xf32>
    %cst_6 = arith.constant 3.000000e+00 : f32
    %7 = vector.broadcast %cst_6 : f32 to vector<64x32xf32>
    %8 = arith.addf %6, %7 : vector<64x32xf32>
    %cst_7 = arith.constant 0.000000e+00 : f32
    %cst_8 = arith.constant 6.000000e+00 : f32
    %9 = vector.broadcast %cst_7 : f32 to vector<64x32xf32>
    %10 = arith.maximumf %9, %8 : vector<64x32xf32>
    %11 = vector.broadcast %cst_8 : f32 to vector<64x32xf32>
    %12 = arith.minimumf %11, %10 : vector<64x32xf32>
    %13 = arith.mulf %6, %12 : vector<64x32xf32>
    %cst_9 = arith.constant 0.166666672 : f32
    %14 = vector.broadcast %cst_9 : f32 to vector<64x32xf32>
    %15 = arith.mulf %13, %14 : vector<64x32xf32>
    %16 = tpu.transpose %15, [1, 0] : vector<64x32xf32> -> vector<32x64xf32>
    %c0_10 = arith.constant 0 : index
    %c0_11 = arith.constant 0 : index
    %c0_12 = arith.constant 0 : index
    %17 = vector.load %arg5[%c0_10, %c0_11, %c0_12] : memref<1x32x64xf32, #tpu.memory_space<vmem>>, vector<1x32x64xf32>
    %18 = vector.shape_cast %17 : vector<1x32x64xf32> to vector<32x64xf32>
    %19 = vector.shape_cast %16 : vector<32x64xf32> to vector<1x32x64xf32>
    tpu.vector_store %arg5[%c0_10, %c0_11, %c0_12], %19 {strides = array<i32>} : memref<1x32x64xf32, #tpu.memory_space<vmem>>, vector<1x32x64xf32>,
    return
  }
  func.func @transform_0(%arg0: i32, %arg1: i32) -> (i32, i32, i32) {
    %c0_i32 = arith.constant 0 : i32
    %c0_i32_0 = arith.constant 0 : i32
    return %arg0, %arg1, %c0_i32 : i32, i32, i32
  }
  func.func @transform_1(%arg0: i32, %arg1: i32) -> (i32, i32) {
    %c0_i32 = arith.constant 0 : i32
    %c0_i32_0 = arith.constant 0 : i32
    %c0_i32_1 = arith.constant 0 : i32
    return %c0_i32, %c0_i32_0 : i32, i32
  }
  func.func @transform_2(%arg0: i32, %arg1: i32) -> (i32, i32) {
    %c0_i32 = arith.constant 0 : i32
    %c0_i32_0 = arith.constant 0 : i32
    %c0_i32_1 = arith.constant 0 : i32
    return %c0_i32, %c0_i32_0 : i32, i32
  }
  func.func @transform_3(%arg0: i32, %arg1: i32) -> (i32, i32, i32) {
    %c0_i32 = arith.constant 0 : i32
    %c0_i32_0 = arith.constant 0 : i32
    return %arg0, %c0_i32, %arg1 : i32, i32, i32
  }
}

</mosaic_0001>

<bundles_post_ra>
// kernel: tpu_custom_call.1
= control target key start
LH: loop header
LB: loop body
LE: loop exit
PB: predicated region body
PF: predicated region fallthrough
CT: control target
= control target key end

     0   :  { %8 = vsyncpa [#allocation3], 0  ;;  %s817_s0 = inlined_call_operand.vmem [shape: bf16[2,64,16], index: 0, kind: input, shape index: {}]   ;;  %s818_s1 = inlined_call_operand.vmem [shape: bf16[16,32], index: 1, kind: input, shape index: {}]   ;;  %s819_s2 = inlined_call_operand.vmem [shape: f32[1,32], index: 2, kind: input, shape index: {}]   ;;  %s820_s3 = inlined_call_operand.hbm [shape: f32[2,32,64], index: 3, kind: output, shape index: {}]  }
   0x1   :  { %10 = vsyncpa [#allocation3 + $0x1], 0  ;;  %s697_s12 = smov 0   ;;  %s699_s13 = smov 0  }
   0x2   :  { %s701_s14 = smov 0   ;;  %s703_s15 = smov 0  }
   0x3   :  { %s705_s16 = smov 0   ;;  %s707_s17 = smov 0  }
   0x4 LB: > { %s491_s18 = sadd.s32 4294967295, %s672_s17   ;;  %s492_s19 = sadd.s32 4294967294, %s672_s17   ;;  %s672_s17 = sphi %s707_s17, %s16_s17   ;;  %s668_s16 = sphi %s705_s16, %s827_s16   ;;  %s664_s15 = sphi %s703_s15, %s826_s15   ;;  %s660_s14 = sphi %s701_s14, %s825_s14   ;;  %s656_s13 = sphi %s699_s13, %s824_s13   ;;  %s652_s12 = sphi %s697_s12, %s823_s12  }
   0x5   : > { %s28_s20 = sadd.s32 1, %s668_s16  ;;  %s107_s21 = sadd.s32 1, %s660_s14 }
   0x6   : > { %p30_p0 = scmp.ge.s32.totalorder %s28_s20, 2  ;;  %p117_p1 = scmp.ne.s32.totalorder %s660_s14, %s656_s13 }
   0x7   : > { %p118_p2 = scmp.eq.s32.totalorder %s491_s18, 1  ;;  %p123_p3 = scmp.ne.s32.totalorder %s656_s13, %s652_s12 }
   0x8   : > { %s829_s20 = smov (%p30_p0, %s28_s20), 0  ;;  %p124_p5 = scmp.eq.s32.totalorder %s492_s19, 1 }
   0x9   : > { %p737_p4 = por %p118_p2, %p117_p1  ;;  %s102_s23 = ssub.s32 %s668_s16, %s829_s20 }
   0xa   : > { %p495_p6 = scmp.ge.s32.totalorder %s672_s17, 1  ;;  %p105_p7 = scmp.eq.s32.totalorder %s102_s23, 0 }
   0xb   : > { %p744_p8 = por %p124_p5, %p123_p3  ;;  %p161_p9 = scmp.lt.s32.totalorder %s672_s17, 3 }
   0xc   : > { %s750_s25 = scalar_select %p105_p7, %s660_s14, %s107_s21  }
   0xd   : > { %p162_p10 = pnand %p495_p6, %p161_p9 }
   0xe   : > { %p190_p11 = scmp.lt.s32.totalorder (!%p162_p10), %s664_s15, 1  ;;  %s186_s8 = sand.u32 (!%p162_p10), 1, %s656_s13  }
   0xf   : > { %165 = sbr.rel (%p162_p10) target bundleno = 384 (0x180), region = 32  ;;  %s496_s9 = sshll.u32 (!%p162_p10), %s186_s8, 5 }
  0x10   : > { %s188_s10 = scalar_lea.vmem (!%p162_p10), [#allocation2], %s496_s9  ;;  %s515_s18 = sshll.u32 (!%p162_p10), %s664_s15, 9 }
  0x11   : > { %s413_s11 = sshll.u32 (!%p162_p10), %s188_s10, 4  ;;  %s770_s23 = scalar_lea.hbm (!%p162_p10), %s820_s3, %s515_s18  ;;  %s765_s11 = int_to_ptr.vmem [resolvable:$true] %s413_s11 }
  0x12   : > { %s772_s26 = scalar_lea.sflag (!%p162_p10), [#allocation3], %s186_s8  ;;  %s596_s27 = scalar_lea.vmem (!%p162_p10), %s765_s11, 512 }
  0x13   : > { %p597_p12 = scmp.ne.s32.totalorder (!%p162_p10), %s765_s11, %s596_s27 }
  0x14   : > { %v591_v0 = vld [vmem:[%s818_s1] sm:$0xff]   ;;  %s191_s28 = scalar_select %p190_p11, %s664_s15, 1  ;;  %vm243_vm0 = vcmask 130048   ;;  %vm393_vm1 = vcmask 523264  }
  0x15   : > { %521 = vmatprep.subr.bf16.mxu0 %v591_v0  ;;  %531 = vmatprep.subr.bf16.mxu1 %v591_v0  ;;  %v499_v5 = vld [vmem:[%s819_s2] ss:$0 sm:$0xff]  ;;  %p598_p13 = pnand %p597_p12, %p737_p4  ;;  %s674_s15 = smov [#allocation2]  }
  0x16   : > { %522 = vmatpush3.bf16.msra.mxu0 %v591_v0  ;;  %532 = vmatpush3.bf16.msra.mxu1 %v591_v0  ;;  %s514_s29 = sshll.u32 %s191_s28, 5  ;;  %s600_s28 = sshll.u32 %s674_s15, 4  ;;  %s601_s28 = int_to_ptr.vmem [resolvable:$false] %s600_s28 }
  0x17   : > { %s197_s5 = scalar_lea.vmem %s817_s0, %s514_s29  ;;  %p599_p0 = pneg %p598_p13 }
  0x18   : > { %v592_v1 = vld [vmem:[%s197_s5] sm:$0xff]   ;;  %v593_v2 = vld [vmem:[%s197_s5 + $0x8] sm:$0xff]   ;;  %v594_v3 = vld [vmem:[%s197_s5 + $0x10] sm:$0xff]   ;;  %s602_s29 = scalar_lea.vmem %s601_s28, 1024  ;;  %p603_p1 = scmp.lt.s32.totalorder %s765_s11, %s601_s28 }
  0x19   : > { %523 = vmatprep.mubr.msk.bf16.mxu0 %vm243_vm0, %v592_v1  ;;  %v595_v4 = vld [vmem:[%s197_s5 + $0x18] sm:$0xff]   ;;  %527 = vmatprep.mubr.msk.bf16.mxu1 %vm243_vm0, %v594_v3  ;;  %p604_p2 = scmp.lt.s32.totalorder %s602_s29, %s596_s27 }
  0x1a   : > { %524 = vmatmul.mubr.msk.bf16.vlgmr.msra.gmra.mxu0 %vm243_vm0, %v593_v2  ;;  %528 = vmatmul.mubr.msk.bf16.vlgmr.msra.gmra.mxu1 %vm243_vm0, %v595_v4 }
  0x1b   : > { %p605_p3 = por %p604_p2, %p603_p1 }
  0x1d   : > { %p606_p5 = pnand %p605_p3, %p599_p0 }
  0xda   : > { %v525_v6 = vpop.f32.mrf.mxu0  ;;  %v529_v9 = vpop.f32.mrf.mxu1 }
  0xdb   : > { %v299_v7 = vadd.f32 %v525_v6, %v499_v5  ;;  %v315_v35 = vadd.f32 %v529_v9, %v499_v5 }
  0xdc   : > { %v290_v8 = vpop.f32.mrf.mxu0  ;;  %v306_v12 = vpop.f32.mrf.mxu1 }
  0xdd   : > { %v291_v10 = vadd.f32 %v499_v5, %v290_v8  ;;  %v323_v13 = vadd.f32 3.0, %v299_v7  ;;  %v307_v23 = vadd.f32 %v499_v5, %v306_v12  ;;  %v327_v41 = vadd.f32 3.0, %v315_v35 }
  0xde   : > { %v526_v11 = vpop.f32.mrf.mxu0  ;;  %v530_v18 = vpop.f32.mrf.mxu1 }
  0xdf   : > { %v321_v14 = vadd.f32 3.0, %v291_v10  ;;  %v302_v15 = vadd.f32 %v526_v11, %v499_v5  ;;  %v331_v20 = vmax.f32 %v323_v13, 0.0  ;;  %v325_v31 = vadd.f32 3.0, %v307_v23 }
  0xe0   : > { %v293_v16 = vpop.f32.mrf.mxu0  ;;  %v309_v26 = vpop.f32.mrf.mxu1  ;;  %v318_v42 = vadd.f32 %v530_v18, %v499_v5  ;;  %v335_v47 = vmax.f32 %v327_v41, 0.0 }
  0xe1   : > { %v294_v17 = vadd.f32 %v499_v5, %v293_v16  ;;  %v329_v19 = vmax.f32 %v321_v14, 0.0  ;;  %v324_v22 = vadd.f32 3.0, %v302_v15  ;;  %v339_v28 = vmin.f32 %v331_v20, 6.0 }
  0xe2   : > { %v310_v32 = vadd.f32 %v499_v5, %v309_v26  ;;  %v333_v38 = vmax.f32 %v325_v31, 0.0  ;;  %v328_v48 = vadd.f32 3.0, %v318_v42  ;;  %v343_v52 = vmin.f32 %v335_v47, 6.0 }
  0xe3   : > { %v322_v21 = vadd.f32 3.0, %v294_v17  ;;  %v337_v24 = vmin.f32 %v329_v19, 6.0  ;;  %v332_v30 = vmax.f32 %v324_v22, 0.0  ;;  %v347_v40 = vmul.f32 %v339_v28, %v299_v7 }
  0xe4   : > { %v326_v39 = vadd.f32 3.0, %v310_v32  ;;  %v341_v43 = vmin.f32 %v333_v38, 6.0  ;;  %v336_v53 = vmax.f32 %v328_v48, 0.0  ;;  %v351_v58 = vmul.f32 %v343_v52, %v315_v35 }
  0xe5   : > { %v330_v25 = vmax.f32 %v322_v21, 0.0  ;;  %v345_v27 = vmul.f32 %v337_v24, %v291_v10  ;;  %v340_v37 = vmin.f32 %v332_v30, 6.0  ;;  %v355_v45 = vmul.f32 0.16666667, %v347_v40 }
  0xe6   : > { %v334_v44 = vmax.f32 %v326_v39, 0.0  ;;  %v349_v51 = vmul.f32 %v341_v43, %v307_v23  ;;  %v344_v56 = vmin.f32 %v336_v53, 6.0  ;;  %v359_v59 = vmul.f32 0.16666667, %v351_v58 }
  0xe7   : > { %v338_v29 = vmin.f32 %v330_v25, 6.0  ;;  %v353_v33 = vmul.f32 0.16666667, %v345_v27  ;;  %v348_v46 = vmul.f32 %v340_v37, %v302_v15 }
  0xe8   : > { %v342_v49 = vmin.f32 %v334_v44, 6.0  ;;  %v357_v54 = vmul.f32 0.16666667, %v349_v51  ;;  %v352_v60 = vmul.f32 %v344_v56, %v318_v42 }
  0xe9   : > { %v346_v34 = vmul.f32 %v338_v29, %v294_v17  ;;  %361 = vxpose.xlu0.b32.start [1/8] (short) (narrow) %v353_v33, 32  ;;  %v356_v50 = vmul.f32 0.16666667, %v348_v46 }
  0xea   : > { %v350_v55 = vmul.f32 %v342_v49, %v310_v32  ;;  %v360_v61 = vmul.f32 0.16666667, %v352_v60 }
  0xeb   : > { %v354_v36 = vmul.f32 0.16666667, %v346_v34 }
  0xec   : > { %v358_v57 = vmul.f32 0.16666667, %v350_v55 }
  0xed   : > { %362 = vxpose.xlu0.b32.cont [2/8] (short) (narrow) %v354_v36, 32 }
  0xf1   : > { %363 = vxpose.xlu0.b32.cont [3/8] (short) (narrow) %v355_v45, 32 }
  0xf5   : > { %364 = vxpose.xlu0.b32.cont [4/8] (short) (narrow) %v356_v50, 32 }
  0xf9   : > { %365 = vxpose.xlu0.b32.cont [5/8] (short) (narrow) %v357_v54, 32 }
  0xfd   : > { %366 = vxpose.xlu0.b32.cont [6/8] (short) (narrow) %v358_v57, 32 }
 0x101   : > { %367 = vxpose.xlu0.b32.cont [7/8] (short) (narrow) %v359_v59, 32 }
 0x105   : > { %368 = vxpose.xlu0.b32.end [8/8] (short) (narrow) %v360_v61, 32 }
 0x165   : > { %v377_v62 = vpop.trf.xlu0 }
 0x166   : > { %394 = vst.msk [vmem:[%s188_s10] sm:$0xff] %vm393_vm1, %v377_v62 }
 0x169   : > { %v378_v63 = vpop.trf.xlu0 }
 0x16a   : > { %395 = vst.msk [vmem:[%s188_s10 + $0x8] sm:$0xff] %vm393_vm1, %v378_v63 }
 0x16d   : > { %v379_v0 = vpop.trf.xlu0 }
 0x16e   : > { %396 = vst.msk [vmem:[%s188_s10 + $0x10] sm:$0xff] %vm393_vm1, %v379_v0 }
 0x171   : > { %v380_v1 = vpop.trf.xlu0 }
 0x172   : > { %397 = vst.msk [vmem:[%s188_s10 + $0x18] sm:$0xff] %vm393_vm1, %v380_v1 }
 0x173   : > { %609 = shalt.err (!%p606_p5)
}
 0x174   : > { %s610_s30 = scalar_lea.hbm %s770_s23, 512  ;;  %s614_s6 = scalar_lea.hbm %s820_s3, 1024 }
 0x175   : > { %p611_p6 = scmp.ne.s32.totalorder %s770_s23, %s610_s30  ;;  %p615_p10 = scmp.lt.s32.totalorder %s770_s23, %s820_s3 }
 0x176   : > { %p616_p11 = scmp.lt.s32.totalorder %s614_s6, %s610_s30 }
 0x177   : > { %p612_p7 = pnand %p611_p6, %p737_p4 }
 0x178   : > { %p617_p12 = por %p616_p11, %p615_p10 }
 0x179   : > { %p613_p9 = pneg %p612_p7 }
 0x17b   : > { %p618_p13 = pnand %p617_p12, %p613_p9 }
 0x17d   : > { %621 = shalt.err (!%p618_p13)
}
 0x17e   : > { %s675_s9 = smov 128   ;;  %s676_s10 = smov 8  }
 0x17f   : > { %533 = dma.vmem_to_hbm [thread:$0]  (%p737_p4), %s765_s11, 512, %s770_s23, %s772_s26, %s675_s9, %s675_s9, %s676_s10  }
 0x180 PF: > { %p539_p0 = scmp.ge.s32.totalorder %s672_s17, 2  ;;  %s428_s18 = sand.u32 1, %s652_s12  }
 0x181   : > { %s429_s19 = scalar_lea.sflag [#allocation3], %s428_s18 }
 0x182   : > { %p536_p1 = pnand %p539_p0, %p744_p8 }
 0x184   : > { %p537_p2 = pneg %p536_p1 }
 0x186   : > { %647 = dma.done.wait (%p537_p2), %s429_s19, 512  }
 0x187   : > { %649 = vsyncadd (%p537_p2), %s429_s19, 4294966784  ;;  %s16_s17 = sadd.s32 1, %s672_s17   ;;  %s823_s12 = smov %s656_s13 }
 0x188   : > { %p13_p3 = scmp.ge.s32.totalorder %s16_s17, 4   ;;  %s824_s13 = smov %s660_s14 }
 0x189   : > { %s825_s14 = smov %s750_s25  ;;  %s826_s15 = smov %s668_s16 }
 0x18a   : > { %s827_s16 = smov %s829_s20  ;;  %15 = sbr.rel (!%p13_p3) target bundleno = 4 (0x4), region = 67 }
 0x18f   :  { %434 = vsyncpa [#allocation3], 1 }
 0x190   :  { %436 = vsyncpa [#allocation3 + $0x1], 1 }

</bundles_post_ra>
